<compile_context>
chip_gen: v6e
topology: v6e:2x2x1
jax: 0.10.0
libtpu: 0.0.40
codegen_flags: <defaults>
</compile_context>

<pallas_src>
import jax
import jax.numpy as jnp
from jax.experimental import pallas as pl
from jax.experimental.pallas import tpu as pltpu


def _round_up(x, m):
    return ((x + m - 1) // m) * m


def _fused_two_layer_kernel(x_ref, w1_ref, w2_ref, o_ref, h_acc):
    """One grid step: accumulate x_tile @ w1t_tile into a f32 VMEM hidden
    accumulator; on the last reduction step apply ReLU (f32) and run the
    second matmul, writing the lane-dense output tile exactly once."""
    k = pl.program_id(1)

    @pl.when(k == 0)
    def _():
        h_acc[...] = jnp.zeros_like(h_acc)

    # First matmul: bf16 inputs, f32 accumulation on the MXU.
    h_acc[...] += jnp.dot(
        x_ref[...], w1_ref[...], preferred_element_type=jnp.float32
    )

    @pl.when(k == pl.num_programs(1) - 1)
    def _():
        h = jnp.maximum(h_acc[...], 0.0)  # ReLU in f32 (v5e-safe)
        # Hidden is fed to the MXU in bf16 (matches the bf16 reference path).
        y = jnp.dot(
            h.astype(w2_ref.dtype), w2_ref[...],
            preferred_element_type=jnp.float32,
        )
        o_ref[...] = y.astype(o_ref.dtype)


def prepare_weights(w1, w2):
    """One-time weight preprocessing (hoist out of the per-call path):
    transpose to (in, out) layout, pad out/in dims to 128 multiples, cast to
    bf16. Returns (w1_p, w2_p, d_out)."""
    H, D_in = w1.shape
    D_out, H2 = w2.shape
    assert H2 == H, "w2 inner dim must match w1 output dim"
    D_in_p = _round_up(D_in, 128)
    H_p = _round_up(H, 128)
    D_out_p = _round_up(D_out, 128)
    w1_p = jnp.zeros((D_in_p, H_p), jnp.bfloat16).at[:D_in, :H].set(
        w1.T.astype(jnp.bfloat16))
    w2_p = jnp.zeros((H_p, D_out_p), jnp.bfloat16).at[:H, :D_out].set(
        w2.T.astype(jnp.bfloat16))
    return w1_p, w2_p, D_out


def _build_call(N_p, D_in_p, H_p, D_out_p, tm, tk, out_dtype, single_buffer_w2):
    """Construct the pallas_call for the given (padded) problem size."""
    w2_spec_kwargs = (
        {"pipeline_mode": pl.Buffered(1)} if single_buffer_w2 else {}
    )
    w2_bufs = 1 if single_buffer_w2 else 2
    out_bytes = jnp.dtype(out_dtype).itemsize

    # Real VMEM footprint of this plan (review item: set vmem_limit_bytes).
    vmem_bytes = (
        2 * tm * tk * 2                     # x tile, bf16, double-buffered
        + 2 * tk * H_p * 2                  # w1^T tile, bf16, double-buffered
        + w2_bufs * H_p * D_out_p * 2       # w2^T resident
        + 2 * tm * D_out_p * out_bytes      # output tile, double-buffered
        + tm * H_p * 4                      # f32 hidden accumulator
    )
    # 25% + 1 MiB headroom for Mosaic-internal scratch; never below the old
    # 16 MiB default, never above what any generation can reasonably grant.
    vmem_limit = min(max(int(vmem_bytes * 1.25) + (1 << 20), 16 << 20),
                     100 << 20)

    return pl.pallas_call(
        _fused_two_layer_kernel,
        out_shape=jax.ShapeDtypeStruct((N_p, D_out_p), out_dtype),
        grid_spec=pltpu.PrefetchScalarGridSpec(
            num_scalar_prefetch=0,
            grid=(N_p // tm, D_in_p // tk),
            in_specs=[
                pl.BlockSpec((tm, tk), lambda i, k: (i, k)),         # x tile
                pl.BlockSpec((tk, H_p), lambda i, k: (k, 0)),        # w1^T tile
                pl.BlockSpec((H_p, D_out_p), lambda i, k: (0, 0),    # w2^T res.
                             **w2_spec_kwargs),
            ],
            out_specs=pl.BlockSpec((tm, D_out_p), lambda i, k: (i, 0)),
            scratch_shapes=[pltpu.VMEM((tm, H_p), jnp.float32)],     # hidden
        ),
        compiler_params=pltpu.CompilerParams(
            # N-tile axis parallel (shards across the 2 TCs on v7x),
            # reduction axis arbitrary (accumulator carried in scratch).
            dimension_semantics=("parallel", "arbitrary"),
            vmem_limit_bytes=vmem_limit,
        ),
    )


def two_layer_net_prepared(x, w1_p, w2_p, d_out, *, tm=256, tk=512,
                           out_dtype=None):
    """Forward pass using weights preprocessed by prepare_weights()."""
    N, D_in = x.shape
    D_in_p, H_p = w1_p.shape
    H_p2, D_out_p = w2_p.shape
    assert H_p2 == H_p and D_in <= D_in_p and d_out <= D_out_p
    out_dtype = x.dtype if out_dtype is None else out_dtype

    # ---- tile sizing ------------------------------------------------------
    # bf16 packs 16 rows per vreg sublane group -> keep tm a multiple of 16.
    tm = _round_up(max(16, min(tm, _round_up(N, 16))), 16)
    # v7x megacore: make sure the parallel i-axis has >=2 blocks for large N.
    if N >= 256 and _round_up(N, tm) // tm < 2:
        tm = max(128, _round_up((N + 1) // 2, 16))
    N_p = _round_up(N, tm)

    tk = _round_up(min(tk, D_in_p), 128)
    while D_in_p % tk != 0:          # tk must tile the padded reduction dim
        tk -= 128

    # ---- input: cast / pad only when actually needed ----------------------
    x_b = x if x.dtype == jnp.bfloat16 else x.astype(jnp.bfloat16)
    if N_p != N or D_in_p != D_in:
        x_p = jnp.zeros((N_p, D_in_p), jnp.bfloat16).at[:N, :D_in].set(x_b)
    else:
        x_p = x_b

    try:
        out_p = _build_call(N_p, D_in_p, H_p, D_out_p, tm, tk, out_dtype,
                            single_buffer_w2=True)(x_p, w1_p, w2_p)
        jax.block_until_ready(out_p)
    except Exception:
        # Installed JAX rejected pl.Buffered(1): fall back to the default
        # double-buffered (still correct; only costs extra VMEM).
        out_p = _build_call(N_p, D_in_p, H_p, D_out_p, tm, tk, out_dtype,
                            single_buffer_w2=False)(x_p, w1_p, w2_p)

    return out_p[:N, :d_out]


def two_layer_net(x, w1, w2, *, tm=256, tk=512, out_dtype=None):
    """relu(x @ w1.T) @ w2.T with PyTorch weight layout w1:(H,D_in), w2:(D_out,H).
    Convenience wrapper; for repeated inference call prepare_weights() once
    and use two_layer_net_prepared()."""
    w1_p, w2_p, d_out = prepare_weights(w1, w2)
    return two_layer_net_prepared(x, w1_p, w2_p, d_out, tm=tm, tk=tk,
                                  out_dtype=out_dtype)


if __name__ == "__main__":
    # Small shapes consistent with the module: N x D_in input, two bias-free
    # linears.
    N, D_in, H, D_out = 8, 32, 64, 16

    key = jax.random.PRNGKey(0)
    kx, k1, k2 = jax.random.split(key, 3)
    x = jax.random.normal(kx, (N, D_in), dtype=jnp.float32)
    # Deterministic "Kaiming-ish" init, PyTorch Linear weight layout (out, in).
    w1 = jax.random.normal(k1, (H, D_in), dtype=jnp.float32) * (1.0 / jnp.sqrt(D_in))
    w2 = jax.random.normal(k2, (D_out, H), dtype=jnp.float32) * (1.0 / jnp.sqrt(H))

    # Weight preprocessing hoisted out of the per-call path (done once).
    w1_p, w2_p, d_out = prepare_weights(w1, w2)
    y = two_layer_net_prepared(x, w1_p, w2_p, d_out)
    jax.block_until_ready(y)

    # Reference matched to the kernel's bf16-input / f32-accumulate path.
    xb = x.astype(jnp.bfloat16).astype(jnp.float32)
    w1b = w1.astype(jnp.bfloat16).astype(jnp.float32)
    w2b = w2.astype(jnp.bfloat16).astype(jnp.float32)
    h_ref = jnp.maximum(xb @ w1b.T, 0.0)
    y_ref = h_ref.astype(jnp.bfloat16).astype(jnp.float32) @ w2b.T

    assert y.shape == (N, D_out)
    assert jnp.allclose(y, y_ref, atol=2e-2, rtol=2e-2), float(
        jnp.max(jnp.abs(y - y_ref)))

    print("KERNEL_OK")
</pallas_src>

<mosaic_0001>
module attributes {stable_mosaic.version = 11 : i64} {
  func.func @_fused_two_layer_kernel(%arg0: i32, %arg1: i32, %arg2: memref<16x128xbf16, #tpu.memory_space<vmem>>, %arg3: memref<128x128xbf16, #tpu.memory_space<vmem>>, %arg4: memref<128x128xbf16, #tpu.memory_space<vmem>>, %arg5: memref<16x128xf32, #tpu.memory_space<vmem>>, %arg6: memref<16x128xf32, #tpu.memory_space<vmem>>) attributes {dimension_semantics = [#tpu.dimension_semantics<parallel>, #tpu.dimension_semantics<arbitrary>], iteration_bounds = array<i64: 1, 1>, scalar_prefetch = 0 : i64, scratch_operands = 1 : i64, tpu.core_type = #tpu.core_type<tc>, window_params = [{transform_indices = @transform_0, window_bounds = array<i64: 16, 128>}, {transform_indices = @transform_1, window_bounds = array<i64: 128, 128>}, {pipeline_mode = #tpu.pipeline_mode<synchronous>, transform_indices = @transform_2, window_bounds = array<i64: 128, 128>}, {transform_indices = @transform_3, window_bounds = array<i64: 16, 128>}]} {
    %c0_i32 = arith.constant 0 : i32
    %0 = arith.cmpi eq, %arg1, %c0_i32 : i32
    %1 = arith.extui %0 : i1 to i32
    %c0_i32_0 = arith.constant 0 : i32
    %2 = arith.cmpi ne, %1, %c0_i32_0 : i32
    scf.if %2 {
      %cst_10 = arith.constant 0.000000e+00 : f32
      %12 = vector.broadcast %cst_10 : f32 to vector<16x128xf32>
      %c0_11 = arith.constant 0 : index
      %c0_12 = arith.constant 0 : index
      %13 = vector.load %arg6[%c0_11, %c0_12] : memref<16x128xf32, #tpu.memory_space<vmem>>, vector<16x128xf32>
      tpu.vector_store %arg6[%c0_11, %c0_12], %12 {strides = array<i32>} : memref<16x128xf32, #tpu.memory_space<vmem>>, vector<16x128xf32>,
    } else {
    }
    %c0 = arith.constant 0 : index
    %c0_1 = arith.constant 0 : index
    %3 = vector.load %arg6[%c0, %c0_1] : memref<16x128xf32, #tpu.memory_space<vmem>>, vector<16x128xf32>
    %c0_2 = arith.constant 0 : index
    %c0_3 = arith.constant 0 : index
    %4 = vector.load %arg2[%c0_2, %c0_3] : memref<16x128xbf16, #tpu.memory_space<vmem>>, vector<16x128xbf16>
    %c0_4 = arith.constant 0 : index
    %c0_5 = arith.constant 0 : index
    %5 = vector.load %arg3[%c0_4, %c0_5] : memref<128x128xbf16, #tpu.memory_space<vmem>>, vector<128x128xbf16>
    %cst = arith.constant dense<0.000000e+00> : vector<16x128xf32>
    %6 = tpu.matmul %4, %5, %cst {dimension_numbers = #tpu.dot_dimension_numbers<[1], [0], [0], [1], [0, 0, 1, 1], [], []>} : vector<16x128xbf16>, vector<128x128xbf16>, vector<16x128xf32> -> vector<16x128xf32>
    %7 = arith.addf %3, %6 : vector<16x128xf32>
    %c0_6 = arith.constant 0 : index
    %c0_7 = arith.constant 0 : index
    %8 = vector.load %arg6[%c0_6, %c0_7] : memref<16x128xf32, #tpu.memory_space<vmem>>, vector<16x128xf32>
    tpu.vector_store %arg6[%c0_6, %c0_7], %7 {strides = array<i32>} : memref<16x128xf32, #tpu.memory_space<vmem>>, vector<16x128xf32>,
    %c0_i32_8 = arith.constant 0 : i32
    %9 = arith.cmpi eq, %arg1, %c0_i32_8 : i32
    %10 = arith.extui %9 : i1 to i32
    %c0_i32_9 = arith.constant 0 : i32
    %11 = arith.cmpi ne, %10, %c0_i32_9 : i32
    scf.if %11 {
      %c0_10 = arith.constant 0 : index
      %c0_11 = arith.constant 0 : index
      %12 = vector.load %arg6[%c0_10, %c0_11] : memref<16x128xf32, #tpu.memory_space<vmem>>, vector<16x128xf32>
      %cst_12 = arith.constant 0.000000e+00 : f32
      %13 = vector.broadcast %cst_12 : f32 to vector<16x128xf32>
      %14 = arith.maximumf %12, %13 : vector<16x128xf32>
      %15 = arith.truncf %14 : vector<16x128xf32> to vector<16x128xbf16>
      %c0_13 = arith.constant 0 : index
      %c0_14 = arith.constant 0 : index
      %16 = vector.load %arg4[%c0_13, %c0_14] : memref<128x128xbf16, #tpu.memory_space<vmem>>, vector<128x128xbf16>
      %cst_15 = arith.constant dense<0.000000e+00> : vector<16x128xf32>
      %17 = tpu.matmul %15, %16, %cst_15 {dimension_numbers = #tpu.dot_dimension_numbers<[1], [0], [0], [1], [0, 0, 1, 1], [], []>} : vector<16x128xbf16>, vector<128x128xbf16>, vector<16x128xf32> -> vector<16x128xf32>
      %c0_16 = arith.constant 0 : index
      %c0_17 = arith.constant 0 : index
      %18 = vector.load %arg5[%c0_16, %c0_17] : memref<16x128xf32, #tpu.memory_space<vmem>>, vector<16x128xf32>
      tpu.vector_store %arg5[%c0_16, %c0_17], %17 {strides = array<i32>} : memref<16x128xf32, #tpu.memory_space<vmem>>, vector<16x128xf32>,
    } else {
    }
    return
  }
  func.func @transform_0(%arg0: i32, %arg1: i32) -> (i32, i32) {
    %c0_i32 = arith.constant 0 : i32
    return %arg0, %arg1 : i32, i32
  }
  func.func @transform_1(%arg0: i32, %arg1: i32) -> (i32, i32) {
    %c0_i32 = arith.constant 0 : i32
    %c0_i32_0 = arith.constant 0 : i32
    return %arg1, %c0_i32 : i32, i32
  }
  func.func @transform_2(%arg0: i32, %arg1: i32) -> (i32, i32) {
    %c0_i32 = arith.constant 0 : i32
    %c0_i32_0 = arith.constant 0 : i32
    %c0_i32_1 = arith.constant 0 : i32
    return %c0_i32, %c0_i32_0 : i32, i32
  }
  func.func @transform_3(%arg0: i32, %arg1: i32) -> (i32, i32) {
    %c0_i32 = arith.constant 0 : i32
    %c0_i32_0 = arith.constant 0 : i32
    return %arg0, %c0_i32 : i32, i32
  }
}

module attributes {stable_mosaic.version = 11 : i64} {
  func.func @_fused_two_layer_kernel(%arg0: i32, %arg1: i32, %arg2: memref<16x128xbf16, #tpu.memory_space<vmem>>, %arg3: memref<128x128xbf16, #tpu.memory_space<vmem>>, %arg4: memref<128x128xbf16, #tpu.memory_space<vmem>>, %arg5: memref<16x128xf32, #tpu.memory_space<vmem>>, %arg6: memref<16x128xf32, #tpu.memory_space<vmem>>) attributes {dimension_semantics = [#tpu.dimension_semantics<parallel>, #tpu.dimension_semantics<arbitrary>], iteration_bounds = array<i64: 1, 1>, scalar_prefetch = 0 : i64, scratch_operands = 1 : i64, tpu.core_type = #tpu.core_type<tc>, window_params = [{transform_indices = @transform_0, window_bounds = array<i64: 16, 128>}, {transform_indices = @transform_1, window_bounds = array<i64: 128, 128>}, {pipeline_mode = #tpu.pipeline_mode<synchronous>, transform_indices = @transform_2, window_bounds = array<i64: 128, 128>}, {transform_indices = @transform_3, window_bounds = array<i64: 16, 128>}]} {
    %c0_i32 = arith.constant 0 : i32
    %0 = arith.cmpi eq, %arg1, %c0_i32 : i32
    %1 = arith.extui %0 : i1 to i32
    %c0_i32_0 = arith.constant 0 : i32
    %2 = arith.cmpi ne, %1, %c0_i32_0 : i32
    scf.if %2 {
      %cst_10 = arith.constant 0.000000e+00 : f32
      %12 = vector.broadcast %cst_10 : f32 to vector<16x128xf32>
      %c0_11 = arith.constant 0 : index
      %c0_12 = arith.constant 0 : index
      %13 = vector.load %arg6[%c0_11, %c0_12] : memref<16x128xf32, #tpu.memory_space<vmem>>, vector<16x128xf32>
      tpu.vector_store %arg6[%c0_11, %c0_12], %12 {strides = array<i32>} : memref<16x128xf32, #tpu.memory_space<vmem>>, vector<16x128xf32>,
    } else {
    }
    %c0 = arith.constant 0 : index
    %c0_1 = arith.constant 0 : index
    %3 = vector.load %arg6[%c0, %c0_1] : memref<16x128xf32, #tpu.memory_space<vmem>>, vector<16x128xf32>
    %c0_2 = arith.constant 0 : index
    %c0_3 = arith.constant 0 : index
    %4 = vector.load %arg2[%c0_2, %c0_3] : memref<16x128xbf16, #tpu.memory_space<vmem>>, vector<16x128xbf16>
    %c0_4 = arith.constant 0 : index
    %c0_5 = arith.constant 0 : index
    %5 = vector.load %arg3[%c0_4, %c0_5] : memref<128x128xbf16, #tpu.memory_space<vmem>>, vector<128x128xbf16>
    %cst = arith.constant dense<0.000000e+00> : vector<16x128xf32>
    %6 = tpu.matmul %4, %5, %cst {dimension_numbers = #tpu.dot_dimension_numbers<[1], [0], [0], [1], [0, 0, 1, 1], [], []>} : vector<16x128xbf16>, vector<128x128xbf16>, vector<16x128xf32> -> vector<16x128xf32>
    %7 = arith.addf %3, %6 : vector<16x128xf32>
    %c0_6 = arith.constant 0 : index
    %c0_7 = arith.constant 0 : index
    %8 = vector.load %arg6[%c0_6, %c0_7] : memref<16x128xf32, #tpu.memory_space<vmem>>, vector<16x128xf32>
    tpu.vector_store %arg6[%c0_6, %c0_7], %7 {strides = array<i32>} : memref<16x128xf32, #tpu.memory_space<vmem>>, vector<16x128xf32>,
    %c0_i32_8 = arith.constant 0 : i32
    %9 = arith.cmpi eq, %arg1, %c0_i32_8 : i32
    %10 = arith.extui %9 : i1 to i32
    %c0_i32_9 = arith.constant 0 : i32
    %11 = arith.cmpi ne, %10, %c0_i32_9 : i32
    scf.if %11 {
      %c0_10 = arith.constant 0 : index
      %c0_11 = arith.constant 0 : index
      %12 = vector.load %arg6[%c0_10, %c0_11] : memref<16x128xf32, #tpu.memory_space<vmem>>, vector<16x128xf32>
      %cst_12 = arith.constant 0.000000e+00 : f32
      %13 = vector.broadcast %cst_12 : f32 to vector<16x128xf32>
      %14 = arith.maximumf %12, %13 : vector<16x128xf32>
      %15 = arith.truncf %14 : vector<16x128xf32> to vector<16x128xbf16>
      %c0_13 = arith.constant 0 : index
      %c0_14 = arith.constant 0 : index
      %16 = vector.load %arg4[%c0_13, %c0_14] : memref<128x128xbf16, #tpu.memory_space<vmem>>, vector<128x128xbf16>
      %cst_15 = arith.constant dense<0.000000e+00> : vector<16x128xf32>
      %17 = tpu.matmul %15, %16, %cst_15 {dimension_numbers = #tpu.dot_dimension_numbers<[1], [0], [0], [1], [0, 0, 1, 1], [], []>} : vector<16x128xbf16>, vector<128x128xbf16>, vector<16x128xf32> -> vector<16x128xf32>
      %c0_16 = arith.constant 0 : index
      %c0_17 = arith.constant 0 : index
      %18 = vector.load %arg5[%c0_16, %c0_17] : memref<16x128xf32, #tpu.memory_space<vmem>>, vector<16x128xf32>
      tpu.vector_store %arg5[%c0_16, %c0_17], %17 {strides = array<i32>} : memref<16x128xf32, #tpu.memory_space<vmem>>, vector<16x128xf32>,
    } else {
    }
    return
  }
  func.func @transform_0(%arg0: i32, %arg1: i32) -> (i32, i32) {
    %c0_i32 = arith.constant 0 : i32
    return %arg0, %arg1 : i32, i32
  }
  func.func @transform_1(%arg0: i32, %arg1: i32) -> (i32, i32) {
    %c0_i32 = arith.constant 0 : i32
    %c0_i32_0 = arith.constant 0 : i32
    return %arg1, %c0_i32 : i32, i32
  }
  func.func @transform_2(%arg0: i32, %arg1: i32) -> (i32, i32) {
    %c0_i32 = arith.constant 0 : i32
    %c0_i32_0 = arith.constant 0 : i32
    %c0_i32_1 = arith.constant 0 : i32
    return %c0_i32, %c0_i32_0 : i32, i32
  }
  func.func @transform_3(%arg0: i32, %arg1: i32) -> (i32, i32) {
    %c0_i32 = arith.constant 0 : i32
    %c0_i32_0 = arith.constant 0 : i32
    return %arg0, %c0_i32 : i32, i32
  }
}

</mosaic_0001>

<bundles_post_ra>
// kernel: tpu_custom_call.1
= control target key start
LH: loop header
LB: loop body
LE: loop exit
PB: predicated region body
PF: predicated region fallthrough
CT: control target
= control target key end

     0   :  { %8 = vsyncpa [#allocation4], 0  ;;  %s545_s0 = inlined_call_operand.hbm [shape: bf16[16,128], index: 0, kind: input, shape index: {}]   ;;  %s546_s1 = inlined_call_operand.hbm [shape: bf16[128,128], index: 1, kind: input, shape index: {}]   ;;  %s547_s2 = inlined_call_operand.hbm [shape: bf16[128,128], index: 2, kind: input, shape index: {}]   ;;  %s548_s3 = inlined_call_operand.hbm [shape: f32[16,128], index: 3, kind: output, shape index: {}]  }
   0x1   :  { %9 = vsyncpa [#allocation7], 0 }
   0x2   :  { %10 = vsyncpa [#allocation5], 0  ;;  %s503_s12 = smov [#allocation6]   ;;  %s504_s14 = smov [#allocation3]  }
   0x3   :  { %s28_s13 = sshll.u32 %s503_s12, 4  ;;  %s16_s15 = sshll.u32 %s504_s14, 4  ;;  %s29_s13 = int_to_ptr.vmem [resolvable:$true] %s28_s13  ;;  %s17_s15 = int_to_ptr.vmem [resolvable:$true] %s16_s15 }
   0x4   :  { %s425_s16 = scalar_lea.vmem %s29_s13, 1024  ;;  %p430_p1 = scmp.lt.s32.totalorder %s29_s13, %s29_s13 }
   0x5   :  { %p426_p0 = scmp.ne.s32.totalorder %s29_s13, %s425_s16  ;;  %p431_p2 = scmp.lt.s32.totalorder %s425_s16, %s425_s16 }
   0x7   :  { %p432_p3 = por %p431_p2, %p430_p1 }
   0x9   :  { %p433_p4 = pnand %p432_p3, %p426_p0 }
   0xb   :  { %436 = shalt.err (!%p433_p4)
}
   0xc   :  { %s505_s17 = smov 64   ;;  %s506_s18 = smov 4  }
   0xd   :  { %34 = dma.hbm_to_vmem [thread:$0]  %s546_s1, 1024, %s29_s13, [#allocation7], %s505_s17, %s505_s17, %s506_s18  }
   0xe   :  { %s445_s21 = scalar_lea.vmem %s17_s15, 128  ;;  %p450_p6 = scmp.lt.s32.totalorder %s17_s15, %s17_s15 }
   0xf   :  { %p446_p5 = scmp.ne.s32.totalorder %s17_s15, %s445_s21  ;;  %p451_p7 = scmp.lt.s32.totalorder %s445_s21, %s445_s21 }
  0x11   :  { %p452_p8 = por %p451_p7, %p450_p6 }
  0x13   :  { %p453_p9 = pnand %p452_p8, %p446_p5 }
  0x15   :  { %456 = shalt.err (!%p453_p9)
}
  0x16   :  { %22 = dma.hbm_to_vmem [thread:$0]  %s545_s0, 128, %s17_s15, [#allocation4], %s505_s17, %s505_s17, %s506_s18  }
  0x17   :  { %s507_s24 = smov [#allocation8]  }
  0x18   :  { %s40_s25 = sshll.u32 %s507_s24, 4  ;;  %s41_s25 = int_to_ptr.vmem [resolvable:$true] %s40_s25 }
  0x19   :  { %s465_s26 = scalar_lea.vmem %s41_s25, 1024  ;;  %p470_p11 = scmp.lt.s32.totalorder %s41_s25, %s41_s25 }
  0x1a   :  { %p466_p10 = scmp.ne.s32.totalorder %s41_s25, %s465_s26  ;;  %p471_p12 = scmp.lt.s32.totalorder %s465_s26, %s465_s26 }
  0x1c   :  { %p472_p13 = por %p471_p12, %p470_p11 }
  0x1e   :  { %p473_p0 = pnand %p472_p13, %p466_p10 }
  0x20   :  { %476 = shalt.err (!%p473_p0)
}
  0x21   :  { %46 = dma.hbm_to_vmem [thread:$0]  %s547_s2, 1024, %s41_s25, [#allocation7], %s505_s17, %s505_s17, %s506_s18  }
  0x22   :  { %497 = dma.done.wait [#allocation4], 128  }
  0x23   :  { %498 = vsyncadd [#allocation4], 4294967168 }
  0x24   :  { %499 = dma.done.wait [#allocation7], 2048  }
  0x25   :  { %500 = vsyncadd [#allocation7], 4294965248  ;;  %v508_v0 = vmov 0.0   ;;  %vm509_vm0 = vmmov 0   ;;  %v400_v1 = vld [vmem:[#allocation6 + $0x38] sm:$0xff]   ;;  %v401_v2 = vld [vmem:[#allocation6 + $0x30] sm:$0xff]  }
  0x26   :  { %350 = vmatprep.subr.bf16.mxu0 %v508_v0  ;;  %366 = vmatprep.mubr.msk.bf16.mxu0 %vm509_vm0, %v508_v0  ;;  %v402_v3 = vld [vmem:[#allocation6 + $0x28] sm:$0xff]   ;;  %v409_v4 = vld [vmem:[#allocation8 + $0x38] sm:$0xff]   ;;  %v403_v5 = vld [vmem:[#allocation6 + $0x20] sm:$0xff]   ;;  %s510_s0 = smov [#allocation9]  }
  0x27   :  { %370 = vmatprep.subr.bf16.mxu1 %v508_v0  ;;  %386 = vmatprep.mubr.msk.bf16.mxu1 %vm509_vm0, %v508_v0  ;;  %v410_v6 = vld [vmem:[#allocation8 + $0x30] sm:$0xff]   ;;  %v404_v7 = vld [vmem:[#allocation6 + $0x18] sm:$0xff]   ;;  %v411_v8 = vld [vmem:[#allocation8 + $0x28] sm:$0xff]   ;;  %s302_s2 = sshll.u32 %s510_s0, 4  ;;  %s303_s2 = int_to_ptr.vmem [resolvable:$true] %s302_s2 }
  0x28   :  { %351 = vmatpush3.bf16.msra.mxu0 %v400_v1  ;;  %371 = vmatpush3.bf16.msra.mxu1 %v409_v4  ;;  %v405_v9 = vld [vmem:[#allocation6 + $0x10] sm:$0xff]   ;;  %v412_v10 = vld [vmem:[#allocation8 + $0x20] sm:$0xff]   ;;  %v406_v11 = vld [vmem:[#allocation6 + $0x8] sm:$0xff]   ;;  %s477_s28 = scalar_lea.vmem %s303_s2, 256  ;;  %p482_p2 = scmp.lt.s32.totalorder %s303_s2, %s303_s2 }
  0x29   :  { %352 = vmatprep.subr.bf16.mxu0 %v508_v0  ;;  %372 = vmatprep.subr.bf16.mxu1 %v508_v0  ;;  %v413_v12 = vld [vmem:[#allocation8 + $0x18] sm:$0xff]   ;;  %v407_v13 = vld [vmem:[#allocation6] sm:$0xff]   ;;  %v414_v14 = vld [vmem:[#allocation8 + $0x10] sm:$0xff]   ;;  %p478_p1 = scmp.ne.s32.totalorder %s303_s2, %s477_s28  ;;  %p483_p3 = scmp.lt.s32.totalorder %s477_s28, %s477_s28 }
  0x2a   :  { %v408_v15 = vld [vmem:[#allocation3] sm:$0xff]   ;;  %v415_v16 = vld [vmem:[#allocation8 + $0x8] sm:$0xff]   ;;  %v416_v17 = vld [vmem:[#allocation8] sm:$0xff]  }
  0x2b   :  { %p484_p4 = por %p483_p3, %p482_p2 }
  0x2c   :  { %353 = vmatpush3.bf16.msra.mxu0 %v401_v2  ;;  %373 = vmatpush3.bf16.msra.mxu1 %v410_v6 }
  0x2d   :  { %354 = vmatprep.subr.bf16.mxu0 %v508_v0  ;;  %374 = vmatprep.subr.bf16.mxu1 %v508_v0  ;;  %p485_p5 = pnand %p484_p4, %p478_p1 }
  0x30   :  { %355 = vmatpush3.bf16.msra.mxu0 %v402_v3  ;;  %375 = vmatpush3.bf16.msra.mxu1 %v411_v8 }
  0x31   :  { %356 = vmatprep.subr.bf16.mxu0 %v508_v0  ;;  %376 = vmatprep.subr.bf16.mxu1 %v508_v0 }
  0x34   :  { %357 = vmatpush3.bf16.msra.mxu0 %v403_v5  ;;  %377 = vmatpush3.bf16.msra.mxu1 %v412_v10 }
  0x35   :  { %358 = vmatprep.subr.bf16.mxu0 %v508_v0  ;;  %378 = vmatprep.subr.bf16.mxu1 %v508_v0 }
  0x38   :  { %359 = vmatpush3.bf16.msra.mxu0 %v404_v7  ;;  %379 = vmatpush3.bf16.msra.mxu1 %v413_v12 }
  0x39   :  { %360 = vmatprep.subr.bf16.mxu0 %v508_v0  ;;  %380 = vmatprep.subr.bf16.mxu1 %v508_v0 }
  0x3c   :  { %361 = vmatpush3.bf16.msra.mxu0 %v405_v9  ;;  %381 = vmatpush3.bf16.msra.mxu1 %v414_v14 }
  0x3d   :  { %362 = vmatprep.subr.bf16.mxu0 %v508_v0  ;;  %382 = vmatprep.subr.bf16.mxu1 %v508_v0 }
  0x40   :  { %363 = vmatpush3.bf16.msra.mxu0 %v406_v11  ;;  %383 = vmatpush3.bf16.msra.mxu1 %v415_v16 }
  0x41   :  { %364 = vmatprep.subr.bf16.mxu0 %v508_v0  ;;  %384 = vmatprep.subr.bf16.mxu1 %v508_v0 }
  0x44   :  { %365 = vmatpush3.bf16.msra.mxu0 %v407_v13  ;;  %385 = vmatpush3.bf16.msra.mxu1 %v416_v17 }
  0x47   :  { %367 = vmatmul.mubr.bf16.vlgmr.msra.gmra.mxu0 %v408_v15 }
 0x107   :  { %v171_v18 = vpop.f32.mrf.mxu0 }
 0x108   :  { %v187_v21 = vmax.f32 %v171_v18, 0.0 }
 0x109   :  { %v368_v19 = vpop.f32.mrf.mxu0 }
 0x10b   :  { %v174_v20 = vpop.f32.mrf.mxu0 }
 0x10c   :  { %v188_v22 = vmax.f32 %v174_v20, 0.0 }
 0x10d   :  { %v369_v23 = vpop.f32.mrf.mxu0 }
 0x10e   :  { %v189_v24 = vpack.c.bf16 %v188_v22, %v187_v21 }
 0x110   :  { %387 = vmatmul.mubr.bf16.vlgmr.msra.gmra.mxu1 %v189_v24 }
 0x1d0   :  { %v288_v25 = vpop.f32.mrf.mxu1 }
 0x1d1   :  { %295 = vst [vmem:[#allocation9] sm:$0xff] %v288_v25 }
 0x1d2   :  { %v388_v26 = vpop.f32.mrf.mxu1 }
 0x1d4   :  { %v291_v27 = vpop.f32.mrf.mxu1 }
 0x1d5   :  { %296 = vst [vmem:[#allocation9 + $0x8] sm:$0xff] %v291_v27 }
 0x1d6   :  { %v389_v28 = vpop.f32.mrf.mxu1 }
 0x1d7   :  { %488 = shalt.err (!%p485_p5)
}
 0x1d8   :  { %s511_s29 = smov 128   ;;  %s512_s30 = smov 8  }
 0x1d9   :  { %308 = dma.vmem_to_hbm [thread:$0]  %s303_s2, 256, %s548_s3, [#allocation5], %s511_s29, %s511_s29, %s512_s30  }
 0x1da   :  { %501 = dma.done.wait [#allocation5], 256  }
 0x1db   :  { %502 = vsyncadd [#allocation5], 4294967040 }
 0x1dc   :  { %312 = vsyncpa [#allocation4], 1 }
 0x1dd   :  { %313 = vsyncpa [#allocation7], 1 }
 0x1de   :  { %314 = vsyncpa [#allocation5], 1 }

// kernel: tpu_custom_call.1
= control target key start
LH: loop header
LB: loop body
LE: loop exit
PB: predicated region body
PF: predicated region fallthrough
CT: control target
= control target key end

     0   :  { %8 = vsyncpa [#allocation4], 0  ;;  %s545_s0 = inlined_call_operand.hbm [shape: bf16[16,128], index: 0, kind: input, shape index: {}]   ;;  %s546_s1 = inlined_call_operand.hbm [shape: bf16[128,128], index: 1, kind: input, shape index: {}]   ;;  %s547_s2 = inlined_call_operand.hbm [shape: bf16[128,128], index: 2, kind: input, shape index: {}]   ;;  %s548_s3 = inlined_call_operand.hbm [shape: f32[16,128], index: 3, kind: output, shape index: {}]  }
   0x1   :  { %9 = vsyncpa [#allocation7], 0 }
   0x2   :  { %10 = vsyncpa [#allocation5], 0  ;;  %s503_s12 = smov [#allocation6]   ;;  %s504_s14 = smov [#allocation3]  }
   0x3   :  { %s28_s13 = sshll.u32 %s503_s12, 4  ;;  %s16_s15 = sshll.u32 %s504_s14, 4  ;;  %s29_s13 = int_to_ptr.vmem [resolvable:$true] %s28_s13  ;;  %s17_s15 = int_to_ptr.vmem [resolvable:$true] %s16_s15 }
   0x4   :  { %s425_s16 = scalar_lea.vmem %s29_s13, 1024  ;;  %p430_p1 = scmp.lt.s32.totalorder %s29_s13, %s29_s13 }
   0x5   :  { %p426_p0 = scmp.ne.s32.totalorder %s29_s13, %s425_s16  ;;  %p431_p2 = scmp.lt.s32.totalorder %s425_s16, %s425_s16 }
   0x7   :  { %p432_p3 = por %p431_p2, %p430_p1 }
   0x9   :  { %p433_p4 = pnand %p432_p3, %p426_p0 }
   0xb   :  { %436 = shalt.err (!%p433_p4)
}
   0xc   :  { %s505_s17 = smov 64   ;;  %s506_s18 = smov 4  }
   0xd   :  { %34 = dma.hbm_to_vmem [thread:$0]  %s546_s1, 1024, %s29_s13, [#allocation7], %s505_s17, %s505_s17, %s506_s18  }
   0xe   :  { %s445_s21 = scalar_lea.vmem %s17_s15, 128  ;;  %p450_p6 = scmp.lt.s32.totalorder %s17_s15, %s17_s15 }
   0xf   :  { %p446_p5 = scmp.ne.s32.totalorder %s17_s15, %s445_s21  ;;  %p451_p7 = scmp.lt.s32.totalorder %s445_s21, %s445_s21 }
  0x11   :  { %p452_p8 = por %p451_p7, %p450_p6 }
  0x13   :  { %p453_p9 = pnand %p452_p8, %p446_p5 }
  0x15   :  { %456 = shalt.err (!%p453_p9)
}
  0x16   :  { %22 = dma.hbm_to_vmem [thread:$0]  %s545_s0, 128, %s17_s15, [#allocation4], %s505_s17, %s505_s17, %s506_s18  }
  0x17   :  { %s507_s24 = smov [#allocation8]  }
  0x18   :  { %s40_s25 = sshll.u32 %s507_s24, 4  ;;  %s41_s25 = int_to_ptr.vmem [resolvable:$true] %s40_s25 }
  0x19   :  { %s465_s26 = scalar_lea.vmem %s41_s25, 1024  ;;  %p470_p11 = scmp.lt.s32.totalorder %s41_s25, %s41_s25 }
  0x1a   :  { %p466_p10 = scmp.ne.s32.totalorder %s41_s25, %s465_s26  ;;  %p471_p12 = scmp.lt.s32.totalorder %s465_s26, %s465_s26 }
  0x1c   :  { %p472_p13 = por %p471_p12, %p470_p11 }
  0x1e   :  { %p473_p0 = pnand %p472_p13, %p466_p10 }
  0x20   :  { %476 = shalt.err (!%p473_p0)
}
  0x21   :  { %46 = dma.hbm_to_vmem [thread:$0]  %s547_s2, 1024, %s41_s25, [#allocation7], %s505_s17, %s505_s17, %s506_s18  }
  0x22   :  { %497 = dma.done.wait [#allocation4], 128  }
  0x23   :  { %498 = vsyncadd [#allocation4], 4294967168 }
  0x24   :  { %499 = dma.done.wait [#allocation7], 2048  }
  0x25   :  { %500 = vsyncadd [#allocation7], 4294965248  ;;  %v508_v0 = vmov 0.0   ;;  %vm509_vm0 = vmmov 0   ;;  %v400_v1 = vld [vmem:[#allocation6 + $0x38] sm:$0xff]   ;;  %v401_v2 = vld [vmem:[#allocation6 + $0x30] sm:$0xff]  }
  0x26   :  { %350 = vmatprep.subr.bf16.mxu0 %v508_v0  ;;  %366 = vmatprep.mubr.msk.bf16.mxu0 %vm509_vm0, %v508_v0  ;;  %v402_v3 = vld [vmem:[#allocation6 + $0x28] sm:$0xff]   ;;  %v409_v4 = vld [vmem:[#allocation8 + $0x38] sm:$0xff]   ;;  %v403_v5 = vld [vmem:[#allocation6 + $0x20] sm:$0xff]   ;;  %s510_s0 = smov [#allocation9]  }
  0x27   :  { %370 = vmatprep.subr.bf16.mxu1 %v508_v0  ;;  %386 = vmatprep.mubr.msk.bf16.mxu1 %vm509_vm0, %v508_v0  ;;  %v410_v6 = vld [vmem:[#allocation8 + $0x30] sm:$0xff]   ;;  %v404_v7 = vld [vmem:[#allocation6 + $0x18] sm:$0xff]   ;;  %v411_v8 = vld [vmem:[#allocation8 + $0x28] sm:$0xff]   ;;  %s302_s2 = sshll.u32 %s510_s0, 4  ;;  %s303_s2 = int_to_ptr.vmem [resolvable:$true] %s302_s2 }
  0x28   :  { %351 = vmatpush3.bf16.msra.mxu0 %v400_v1  ;;  %371 = vmatpush3.bf16.msra.mxu1 %v409_v4  ;;  %v405_v9 = vld [vmem:[#allocation6 + $0x10] sm:$0xff]   ;;  %v412_v10 = vld [vmem:[#allocation8 + $0x20] sm:$0xff]   ;;  %v406_v11 = vld [vmem:[#allocation6 + $0x8] sm:$0xff]   ;;  %s477_s28 = scalar_lea.vmem %s303_s2, 256  ;;  %p482_p2 = scmp.lt.s32.totalorder %s303_s2, %s303_s2 }
  0x29   :  { %352 = vmatprep.subr.bf16.mxu0 %v508_v0  ;;  %372 = vmatprep.subr.bf16.mxu1 %v508_v0  ;;  %v413_v12 = vld [vmem:[#allocation8 + $0x18] sm:$0xff]   ;;  %v407_v13 = vld [vmem:[#allocation6] sm:$0xff]   ;;  %v414_v14 = vld [vmem:[#allocation8 + $0x10] sm:$0xff]   ;;  %p478_p1 = scmp.ne.s32.totalorder %s303_s2, %s477_s28  ;;  %p483_p3 = scmp.lt.s32.totalorder %s477_s28, %s477_s28 }
  0x2a   :  { %v408_v15 = vld [vmem:[#allocation3] sm:$0xff]   ;;  %v415_v16 = vld [vmem:[#allocation8 + $0x8] sm:$0xff]   ;;  %v416_v17 = vld [vmem:[#allocation8] sm:$0xff]  }
  0x2b   :  { %p484_p4 = por %p483_p3, %p482_p2 }
  0x2c   :  { %353 = vmatpush3.bf16.msra.mxu0 %v401_v2  ;;  %373 = vmatpush3.bf16.msra.mxu1 %v410_v6 }
  0x2d   :  { %354 = vmatprep.subr.bf16.mxu0 %v508_v0  ;;  %374 = vmatprep.subr.bf16.mxu1 %v508_v0  ;;  %p485_p5 = pnand %p484_p4, %p478_p1 }
  0x30   :  { %355 = vmatpush3.bf16.msra.mxu0 %v402_v3  ;;  %375 = vmatpush3.bf16.msra.mxu1 %v411_v8 }
  0x31   :  { %356 = vmatprep.subr.bf16.mxu0 %v508_v0  ;;  %376 = vmatprep.subr.bf16.mxu1 %v508_v0 }
  0x34   :  { %357 = vmatpush3.bf16.msra.mxu0 %v403_v5  ;;  %377 = vmatpush3.bf16.msra.mxu1 %v412_v10 }
  0x35   :  { %358 = vmatprep.subr.bf16.mxu0 %v508_v0  ;;  %378 = vmatprep.subr.bf16.mxu1 %v508_v0 }
  0x38   :  { %359 = vmatpush3.bf16.msra.mxu0 %v404_v7  ;;  %379 = vmatpush3.bf16.msra.mxu1 %v413_v12 }
  0x39   :  { %360 = vmatprep.subr.bf16.mxu0 %v508_v0  ;;  %380 = vmatprep.subr.bf16.mxu1 %v508_v0 }
  0x3c   :  { %361 = vmatpush3.bf16.msra.mxu0 %v405_v9  ;;  %381 = vmatpush3.bf16.msra.mxu1 %v414_v14 }
  0x3d   :  { %362 = vmatprep.subr.bf16.mxu0 %v508_v0  ;;  %382 = vmatprep.subr.bf16.mxu1 %v508_v0 }
  0x40   :  { %363 = vmatpush3.bf16.msra.mxu0 %v406_v11  ;;  %383 = vmatpush3.bf16.msra.mxu1 %v415_v16 }
  0x41   :  { %364 = vmatprep.subr.bf16.mxu0 %v508_v0  ;;  %384 = vmatprep.subr.bf16.mxu1 %v508_v0 }
  0x44   :  { %365 = vmatpush3.bf16.msra.mxu0 %v407_v13  ;;  %385 = vmatpush3.bf16.msra.mxu1 %v416_v17 }
  0x47   :  { %367 = vmatmul.mubr.bf16.vlgmr.msra.gmra.mxu0 %v408_v15 }
 0x107   :  { %v171_v18 = vpop.f32.mrf.mxu0 }
 0x108   :  { %v187_v21 = vmax.f32 %v171_v18, 0.0 }
 0x109   :  { %v368_v19 = vpop.f32.mrf.mxu0 }
 0x10b   :  { %v174_v20 = vpop.f32.mrf.mxu0 }
 0x10c   :  { %v188_v22 = vmax.f32 %v174_v20, 0.0 }
 0x10d   :  { %v369_v23 = vpop.f32.mrf.mxu0 }
 0x10e   :  { %v189_v24 = vpack.c.bf16 %v188_v22, %v187_v21 }
 0x110   :  { %387 = vmatmul.mubr.bf16.vlgmr.msra.gmra.mxu1 %v189_v24 }
 0x1d0   :  { %v288_v25 = vpop.f32.mrf.mxu1 }
 0x1d1   :  { %295 = vst [vmem:[#allocation9] sm:$0xff] %v288_v25 }
 0x1d2   :  { %v388_v26 = vpop.f32.mrf.mxu1 }
 0x1d4   :  { %v291_v27 = vpop.f32.mrf.mxu1 }
 0x1d5   :  { %296 = vst [vmem:[#allocation9 + $0x8] sm:$0xff] %v291_v27 }
 0x1d6   :  { %v389_v28 = vpop.f32.mrf.mxu1 }
 0x1d7   :  { %488 = shalt.err (!%p485_p5)
}
 0x1d8   :  { %s511_s29 = smov 128   ;;  %s512_s30 = smov 8  }
 0x1d9   :  { %308 = dma.vmem_to_hbm [thread:$0]  %s303_s2, 256, %s548_s3, [#allocation5], %s511_s29, %s511_s29, %s512_s30  }
 0x1da   :  { %501 = dma.done.wait [#allocation5], 256  }
 0x1db   :  { %502 = vsyncadd [#allocation5], 4294967040 }
 0x1dc   :  { %312 = vsyncpa [#allocation4], 1 }
 0x1dd   :  { %313 = vsyncpa [#allocation7], 1 }
 0x1de   :  { %314 = vsyncpa [#allocation5], 1 }

</bundles_post_ra>
